<compile_context>
chip_gen: v7x
topology: tpu7x:2x2x1
jax: 0.10.0
libtpu: 0.0.40
codegen_flags: <defaults>
</compile_context>

<pallas_src>
import math
from functools import partial

import jax
import jax.numpy as jnp
from jax import lax
from jax.experimental import pallas as pl
from jax.experimental.pallas import tpu as pltpu

_NEG_INF = -1e9  # finite "masked out" additive value (safe with online softmax)


def _round_up(n, m):
    return ((n + m - 1) // m) * m


def _choose_tile(n, candidates=(256, 128)):
    for c in candidates:
        if n >= c:
            return c
    return _round_up(max(n, 1), 8)


# ---------------------------------------------------------------------------
# Fused linear projection kernel:  y = x @ W + b   (bf16 in, f32 accumulate)
# ---------------------------------------------------------------------------
def _proj_kernel(x_ref, w_ref, b_ref, o_ref):
    acc = jnp.dot(x_ref[...], w_ref[...], preferred_element_type=jnp.float32)
    o_ref[...] = (acc + b_ref[...]).astype(o_ref.dtype)


def _fused_linear(x2d, w, b):
    """x2d: (M, Din).  w: (Din, Dout).  b: (Dout,).  Returns (M, Dout) bf16."""
    M, Din = x2d.shape
    Dout = w.shape[1]
    tm = _choose_tile(M)
    Mp = _round_up(M, tm)

    x_p = jnp.pad(x2d.astype(jnp.bfloat16), ((0, Mp - M), (0, 0)))
    w_b = w.astype(jnp.bfloat16)
    b2d = b.astype(jnp.float32).reshape(1, Dout)

    cost = pl.CostEstimate(
        flops=2 * Mp * Din * Dout,
        transcendentals=0,
        bytes_accessed=Mp * Din * 2 + Din * Dout * 2 + Dout * 4 + Mp * Dout * 2,
    )
    out = pl.pallas_call(
        _proj_kernel,
        out_shape=jax.ShapeDtypeStruct((Mp, Dout), jnp.bfloat16),
        grid_spec=pltpu.PrefetchScalarGridSpec(
            num_scalar_prefetch=0,
            grid=(Mp // tm,),
            in_specs=[
                pl.BlockSpec((tm, Din), lambda i: (i, 0)),    # x row tile
                pl.BlockSpec((Din, Dout), lambda i: (0, 0)),  # W (VMEM-resident)
                pl.BlockSpec((1, Dout), lambda i: (0, 0)),    # bias
            ],
            out_specs=pl.BlockSpec((tm, Dout), lambda i: (i, 0)),
        ),
        compiler_params=pltpu.CompilerParams(
            dimension_semantics=("parallel",)),
        cost_estimate=cost,
    )(x_p, w_b, b2d)
    return out[:M]


# ---------------------------------------------------------------------------
# Flash-style multi-head attention kernel (head-batched, online softmax,
# additive mask, lane-dense (tq, all_head_size) output)
# ---------------------------------------------------------------------------
def _mha_kernel(mask_ref, q_ref, k_ref, v_ref, o_ref, m_sc, l_sc, acc_sc, *,
                scale, num_heads, head_dim):
    ki = pl.program_id(2)

    @pl.when(ki == 0)
    def _():
        m_sc[...] = jnp.full_like(m_sc, -jnp.inf)
        l_sc[...] = jnp.zeros_like(l_sc)
        acc_sc[...] = jnp.zeros_like(acc_sc)

    # Head-batched scores for this (q-tile, kv-tile): (H, tq, tk), f32 on MXU.
    s = lax.dot_general(q_ref[...], k_ref[...],
                        (((2,), (2,)), ((0,), (0,))),
                        preferred_element_type=jnp.float32)
    # additive mask broadcast over heads and query rows: (1, tk) -> (H, tq, tk)
    s = s * scale + mask_ref[0:1, :]

    m_prev = m_sc[...]                                       # (H, tq, 1)
    m_new = jnp.maximum(m_prev, s.max(axis=-1, keepdims=True))
    alpha = jnp.exp(m_prev - m_new)
    p = jnp.exp(s - m_new)                                   # (H, tq, tk)
    l_sc[...] = alpha * l_sc[...] + p.sum(axis=-1, keepdims=True)
    acc_sc[...] = alpha * acc_sc[...] + lax.dot_general(
        p.astype(v_ref.dtype), v_ref[...],
        (((2,), (1,)), ((0,), (0,))),
        preferred_element_type=jnp.float32)                  # (H, tq, dh)
    m_sc[...] = m_new

    @pl.when(ki == pl.num_programs(2) - 1)
    def _():
        ctx = acc_sc[...] * pl.reciprocal(l_sc[...], approx=True)  # (H, tq, dh)
        # Emit the context already merged over heads -> one lane-dense store
        # of width num_heads*head_dim (no post-kernel transpose needed).
        parts = [ctx[h] for h in range(num_heads)]
        o_ref[...] = jnp.concatenate(parts, axis=-1).astype(o_ref.dtype)


def _flash_attention(q, k, v, mask_rows, *, scale, out_dtype):
    """q: (B,H,Sq,dh) bf16; k,v: (B,H,Sk,dh) bf16; mask_rows: (B,Sk) additive.

    Returns context in (B, Sq, H*dh) layout (heads already merged)."""
    B, H, Sq, dh = q.shape
    Sk = k.shape[2]
    A = H * dh

    tq = _choose_tile(Sq, (256, 128))
    tk = _choose_tile(Sk, (128,))
    Sqp = _round_up(Sq, tq)
    Skp = _round_up(Sk, tk)

    q_p = jnp.pad(q, ((0, 0), (0, 0), (0, Sqp - Sq), (0, 0)))
    k_p = jnp.pad(k, ((0, 0), (0, 0), (0, Skp - Sk), (0, 0)))
    v_p = jnp.pad(v, ((0, 0), (0, 0), (0, Skp - Sk), (0, 0)))

    # (B, 8, Skp) additive mask; padded KV columns get a big negative value.
    # The 8 sublane rows keep the mask BlockSpec's trailing dims (8, tk)-legal.
    mask_p = jnp.pad(mask_rows.astype(jnp.float32), ((0, 0), (0, Skp - Sk)),
                     constant_values=_NEG_INF)
    mask_p = jnp.broadcast_to(mask_p[:, None, :], (B, 8, Skp))

    cost = pl.CostEstimate(
        flops=4 * B * H * Sqp * Skp * dh,
        transcendentals=B * H * Sqp * Skp,
        bytes_accessed=(q_p.size + k_p.size + v_p.size) * 2
        + mask_p.size * 4 + B * Sqp * A * jnp.dtype(out_dtype).itemsize,
    )

    out = pl.pallas_call(
        partial(_mha_kernel, scale=scale, num_heads=H, head_dim=dh),
        out_shape=jax.ShapeDtypeStruct((B, Sqp, A), out_dtype),
        grid_spec=pltpu.PrefetchScalarGridSpec(
            num_scalar_prefetch=0,
            grid=(B, Sqp // tq, Skp // tk),
            in_specs=[
                pl.BlockSpec((None, 8, tk),
                             lambda b, qi, ki: (b, 0, ki)),        # mask
                pl.BlockSpec((None, H, tq, dh),
                             lambda b, qi, ki: (b, 0, qi, 0)),     # q (all heads)
                pl.BlockSpec((None, H, tk, dh),
                             lambda b, qi, ki: (b, 0, ki, 0)),     # k (all heads)
                pl.BlockSpec((None, H, tk, dh),
                             lambda b, qi, ki: (b, 0, ki, 0)),     # v (all heads)
            ],
            out_specs=pl.BlockSpec((None, tq, A),
                                   lambda b, qi, ki: (b, qi, 0)),  # lane-dense
            scratch_shapes=[
                pltpu.VMEM((H, tq, 1), jnp.float32),   # running max
                pltpu.VMEM((H, tq, 1), jnp.float32),   # running denom
                pltpu.VMEM((H, tq, dh), jnp.float32),  # output accumulator
            ],
        ),
        compiler_params=pltpu.CompilerParams(
            dimension_semantics=("parallel", "parallel", "arbitrary")),
        cost_estimate=cost,
    )(mask_p, q_p, k_p, v_p)

    return out[:, :Sq, :]


# ---------------------------------------------------------------------------
# Module-level forward
# ---------------------------------------------------------------------------
def blip2_qformer_mha(hidden_states, params, num_heads,
                      attention_mask=None, encoder_hidden_states=None,
                      encoder_attention_mask=None, past_key_value=None):
    """Forward of CustomBlip2QFormerMultiHeadAttention (eval mode,
    position_embedding_type='absolute', output_attentions=False).

    params = (wq, bq, wk, bk, wv, bv); weights have shape
    (in_features, out_features), i.e. transposed vs. PyTorch nn.Linear.weight.
    Masks are HF additive masks (0 / large-negative), shape (B, Sk) or
    (B, 1, 1, Sk).  Returns (context_layer, (key_layer, value_layer)).
    """
    wq, bq, wk, bk, wv, bv = params
    B, Sq, _ = hidden_states.shape
    A = wq.shape[1]
    dh = A // num_heads
    dtype = hidden_states.dtype

    is_cross = encoder_hidden_states is not None
    kv_input = encoder_hidden_states if is_cross else hidden_states
    Sk = kv_input.shape[1]

    if is_cross:
        q2d = _fused_linear(hidden_states.reshape(B * Sq, -1), wq, bq)
        wkv = jnp.concatenate([wk, wv], axis=1)
        bkv = jnp.concatenate([bk, bv], axis=0)
        kv2d = _fused_linear(kv_input.reshape(B * Sk, -1), wkv, bkv)
        k2d, v2d = kv2d[:, :A], kv2d[:, A:]
        mask = encoder_attention_mask          # matches HF module behaviour
    else:
        wqkv = jnp.concatenate([wq, wk, wv], axis=1)
        bqkv = jnp.concatenate([bq, bk, bv], axis=0)
        qkv2d = _fused_linear(hidden_states.reshape(B * Sq, -1), wqkv, bqkv)
        q2d, k2d, v2d = qkv2d[:, :A], qkv2d[:, A:2 * A], qkv2d[:, 2 * A:]
        mask = attention_mask

    def to_heads(x2d, S):
        return x2d.reshape(B, S, num_heads, dh).transpose(0, 2, 1, 3)

    q = to_heads(q2d, Sq)
    k = to_heads(k2d, Sk)   # also returned as past_key_value, so the
    v = to_heads(v2d, Sk)   # head-split layout is materialized anyway

    if past_key_value is not None:
        k = jnp.concatenate([past_key_value[0].astype(k.dtype), k], axis=2)
        v = jnp.concatenate([past_key_value[1].astype(v.dtype), v], axis=2)
        Sk = k.shape[2]

    if mask is None:
        mask_rows = jnp.zeros((B, Sk), dtype=jnp.float32)
    else:
        mask_rows = mask.reshape(B, Sk).astype(jnp.float32)

    ctx = _flash_attention(q, k, v, mask_rows,
                           scale=1.0 / math.sqrt(dh),
                           out_dtype=jnp.float32)     # already (B, Sq, A)
    ctx = ctx.astype(dtype)

    key_layer = k.astype(dtype)
    value_layer = v.astype(dtype)

    # TODO(synk): attention-probs dropout is inference-mode identity here.
    # TODO(synk): head_mask, output_attentions (materialized probs), and
    #             relative_key / relative_key_query position embeddings are
    #             not implemented in the fused flash-style kernel.
    return ctx, (key_layer, value_layer)


# ---------------------------------------------------------------------------
# Deterministic init + pure-JAX f32 reference
# ---------------------------------------------------------------------------
def init_params(key, hidden_size, encoder_hidden_size=None):
    all_head = hidden_size
    kv_in = encoder_hidden_size if encoder_hidden_size is not None else hidden_size
    dims = [(hidden_size, all_head), (kv_in, all_head), (kv_in, all_head)]
    params = []
    for fan_in, fan_out in dims:
        key, kw, kb = jax.random.split(key, 3)
        bound = 1.0 / math.sqrt(fan_in)
        w = jax.random.uniform(kw, (fan_in, fan_out), jnp.float32, -bound, bound)
        b = jax.random.uniform(kb, (fan_out,), jnp.float32, -bound, bound)
        params += [w, b]
    return tuple(params)


def reference(hidden_states, params, num_heads, attention_mask=None,
              encoder_hidden_states=None):
    wq, bq, wk, bk, wv, bv = params
    kv_in = encoder_hidden_states if encoder_hidden_states is not None \
        else hidden_states
    B, Sq, _ = hidden_states.shape
    Sk = kv_in.shape[1]
    A = wq.shape[1]
    dh = A // num_heads

    q = hidden_states @ wq + bq
    k = kv_in @ wk + bk
    v = kv_in @ wv + bv

    def split(x, S):
        return x.reshape(B, S, num_heads, dh).transpose(0, 2, 1, 3)

    q, k, v = split(q, Sq), split(k, Sk), split(v, Sk)
    scores = jnp.einsum('bhqd,bhkd->bhqk', q, k) / math.sqrt(dh)
    if attention_mask is not None:
        scores = scores + attention_mask.reshape(B, 1, 1, Sk)
    probs = jax.nn.softmax(scores, axis=-1)
    ctx = jnp.einsum('bhqk,bhkd->bhqd', probs, v)
    ctx = ctx.transpose(0, 2, 1, 3).reshape(B, Sq, A)
    return ctx, (k, v)


if __name__ == "__main__":
    B, S, hidden, heads = 2, 8, 32, 4
    enc_S, enc_hidden = 10, 48   # non-multiple-of-8 length exercises padding

    key = jax.random.PRNGKey(0)
    kx, kenc, kp, kpc = jax.random.split(key, 4)
    hidden_states = jax.random.normal(kx, (B, S, hidden), dtype=jnp.float32)
    params = init_params(kp, hidden)

    # HF-style additive mask: 0 = attend, -10000 = masked.  Mask the last two
    # key positions of batch element 1.
    attention_mask = jnp.zeros((B, S), dtype=jnp.float32)
    attention_mask = attention_mask.at[1, -2:].set(-10000.0)

    # --- self-attention path ------------------------------------------------
    ctx, (k_layer, v_layer) = blip2_qformer_mha(
        hidden_states, params, heads, attention_mask=attention_mask)
    ctx = jax.block_until_ready(ctx)

    ref_ctx, (ref_k, ref_v) = reference(
        hidden_states, params, heads, attention_mask=attention_mask)

    assert ctx.shape == (B, S, hidden)
    assert k_layer.shape == (B, heads, S, hidden // heads)
    assert v_layer.shape == (B, heads, S, hidden // heads)
    # bf16 matmul operands (f32 accumulation) vs. an all-f32 reference.
    assert jnp.allclose(ctx, ref_ctx, atol=3e-2, rtol=3e-2), (
        float(jnp.max(jnp.abs(ctx - ref_ctx))))
    assert jnp.allclose(k_layer, ref_k, atol=3e-2, rtol=3e-2)
    assert jnp.allclose(v_layer, ref_v, atol=3e-2, rtol=3e-2)

    # --- cross-attention path ------------------------------------------------
    enc_states = jax.random.normal(kenc, (B, enc_S, enc_hidden),
                                   dtype=jnp.float32)
    cross_params = init_params(kpc, hidden, encoder_hidden_size=enc_hidden)
    enc_mask = jnp.zeros((B, enc_S), dtype=jnp.float32)
    enc_mask = enc_mask.at[0, -3:].set(-10000.0)

    ctx_c, (kc, vc) = blip2_qformer_mha(
        hidden_states, cross_params, heads,
        encoder_hidden_states=enc_states, encoder_attention_mask=enc_mask)
    ctx_c = jax.block_until_ready(ctx_c)

    ref_ctx_c, (ref_kc, ref_vc) = reference(
        hidden_states, cross_params, heads, attention_mask=enc_mask,
        encoder_hidden_states=enc_states)

    assert ctx_c.shape == (B, S, hidden)
    assert jnp.allclose(ctx_c, ref_ctx_c, atol=3e-2, rtol=3e-2), (
        float(jnp.max(jnp.abs(ctx_c - ref_ctx_c))))
    assert jnp.allclose(kc, ref_kc, atol=3e-2, rtol=3e-2)
    assert jnp.allclose(vc, ref_vc, atol=3e-2, rtol=3e-2)

    print("KERNEL_OK")
</pallas_src>

<mosaic_0001>
module attributes {stable_mosaic.version = 11 : i64} {
  func.func @_proj_kernel(%arg0: i32, %arg1: memref<16x32xbf16, #tpu.memory_space<vmem>>, %arg2: memref<32x96xbf16, #tpu.memory_space<vmem>>, %arg3: memref<1x96xf32, #tpu.memory_space<vmem>>, %arg4: memref<16x96xbf16, #tpu.memory_space<vmem>>) attributes {dimension_semantics = [#tpu.dimension_semantics<parallel>], iteration_bounds = array<i64: 1>, scalar_prefetch = 0 : i64, scratch_operands = 0 : i64, tpu.core_type = #tpu.core_type<tc>, window_params = [{transform_indices = @transform_0, window_bounds = array<i64: 16, 32>}, {pipeline_mode = #tpu.pipeline_mode<synchronous>, transform_indices = @transform_1, window_bounds = array<i64: 32, 96>}, {pipeline_mode = #tpu.pipeline_mode<synchronous>, transform_indices = @transform_2, window_bounds = array<i64: 1, 96>}, {transform_indices = @transform_3, window_bounds = array<i64: 16, 96>}]} {
    %c0 = arith.constant 0 : index
    %c0_0 = arith.constant 0 : index
    %0 = vector.load %arg1[%c0, %c0_0] : memref<16x32xbf16, #tpu.memory_space<vmem>>, vector<16x32xbf16>
    %c0_1 = arith.constant 0 : index
    %c0_2 = arith.constant 0 : index
    %1 = vector.load %arg2[%c0_1, %c0_2] : memref<32x96xbf16, #tpu.memory_space<vmem>>, vector<32x96xbf16>
    %cst = arith.constant dense<0.000000e+00> : vector<16x96xf32>
    %2 = tpu.matmul %0, %1, %cst {dimension_numbers = #tpu.dot_dimension_numbers<[1], [0], [0], [1], [0, 0, 1, 1], [], []>} : vector<16x32xbf16>, vector<32x96xbf16>, vector<16x96xf32> -> vector<16x96xf32>
    %c0_3 = arith.constant 0 : index
    %c0_4 = arith.constant 0 : index
    %3 = vector.load %arg3[%c0_3, %c0_4] : memref<1x96xf32, #tpu.memory_space<vmem>>, vector<1x96xf32>
    %4 = vector.broadcast %3 : vector<1x96xf32> to vector<16x96xf32>
    %5 = arith.addf %2, %4 : vector<16x96xf32>
    %6 = arith.truncf %5 : vector<16x96xf32> to vector<16x96xbf16>
    %c0_5 = arith.constant 0 : index
    %c0_6 = arith.constant 0 : index
    %7 = vector.load %arg4[%c0_5, %c0_6] : memref<16x96xbf16, #tpu.memory_space<vmem>>, vector<16x96xbf16>
    tpu.vector_store %arg4[%c0_5, %c0_6], %6 {strides = array<i32>} : memref<16x96xbf16, #tpu.memory_space<vmem>>, vector<16x96xbf16>,
    return
  }
  func.func @transform_0(%arg0: i32) -> (i32, i32) {
    %c0_i32 = arith.constant 0 : i32
    %c0_i32_0 = arith.constant 0 : i32
    return %arg0, %c0_i32 : i32, i32
  }
  func.func @transform_1(%arg0: i32) -> (i32, i32) {
    %c0_i32 = arith.constant 0 : i32
    %c0_i32_0 = arith.constant 0 : i32
    %c0_i32_1 = arith.constant 0 : i32
    return %c0_i32, %c0_i32_0 : i32, i32
  }
  func.func @transform_2(%arg0: i32) -> (i32, i32) {
    %c0_i32 = arith.constant 0 : i32
    %c0_i32_0 = arith.constant 0 : i32
    %c0_i32_1 = arith.constant 0 : i32
    return %c0_i32, %c0_i32_0 : i32, i32
  }
  func.func @transform_3(%arg0: i32) -> (i32, i32) {
    %c0_i32 = arith.constant 0 : i32
    %c0_i32_0 = arith.constant 0 : i32
    return %arg0, %c0_i32 : i32, i32
  }
}

</mosaic_0001>

<bundles_post_ra>
// kernel: tpu_custom_call.1
= control target key start
LH: loop header
LB: loop body
LE: loop exit
PB: predicated region body
PF: predicated region fallthrough
CT: control target
= control target key end

     0   :  { %8 = vsyncpa [#allocation3], 0  ;;  %s325_s0 = inlined_call_operand.hbm [shape: bf16[16,32], index: 0, kind: input, shape index: {}]   ;;  %s326_s1 = inlined_call_operand.hbm [shape: bf16[32,96], index: 1, kind: input, shape index: {}]   ;;  %s327_s2 = inlined_call_operand.vmem [shape: f32[1,96], index: 2, kind: input, shape index: {}]   ;;  %s328_s3 = inlined_call_operand.hbm [shape: bf16[16,96], index: 3, kind: output, shape index: {}]  }
   0x1   :  { %9 = vsyncpa [#allocation6], 0 }
   0x2   :  { %10 = vsyncpa [#allocation4], 0  ;;  %s250_s12 = smov [#allocation2]   ;;  %s178_s16 = scalar_lea.hbm %s325_s0, 128 }
   0x3   :  { %s16_s13 = sshll.u32 %s250_s12, 4  ;;  %p179_p0 = scmp.ne.s32.totalorder %s325_s0, %s178_s16  ;;  %s17_s13 = int_to_ptr.vmem [resolvable:$true] %s16_s13 }
   0x4   :  { %p182_p1 = scmp.lt.u32.totalorder %s178_s16, %s325_s0 }
   0x6   :  { %p184_p2 = pnand %p182_p1, %p179_p0 }
   0x8   :  { %187 = shalt.err (!%p184_p2)
}
   0x9   :  { %s188_s21 = scalar_lea.vmem %s17_s13, 128  ;;  %p193_p4 = scmp.lt.s32.totalorder %s17_s13, %s17_s13 }
   0xa   :  { %p189_p3 = scmp.ne.s32.totalorder %s17_s13, %s188_s21  ;;  %p194_p5 = scmp.lt.s32.totalorder %s188_s21, %s188_s21 }
   0xc   :  { %p195_p6 = por %p194_p5, %p193_p4 }
   0xe   :  { %p196_p7 = pnand %p195_p6, %p189_p3 }
  0x10   :  { %199 = shalt.err (!%p196_p7)
}
  0x11   :  { %s251_s22 = smov 64   ;;  %s252_s23 = smov 4  }
  0x12   :  { %22 = dma.hbm_to_vmem [thread:$0]  %s325_s0, 128, %s17_s13, [#allocation3], %s251_s22, %s251_s22, %s252_s23  }
  0x13   :  { %s253_s26 = smov [#allocation5]   ;;  %s200_s30 = scalar_lea.hbm %s326_s1, 256 }
  0x14   :  { %s28_s27 = sshll.u32 %s253_s26, 4  ;;  %p201_p8 = scmp.ne.s32.totalorder %s326_s1, %s200_s30  ;;  %s29_s27 = int_to_ptr.vmem [resolvable:$true] %s28_s27 }
  0x15   :  { %p204_p9 = scmp.lt.u32.totalorder %s200_s30, %s326_s1 }
  0x17   :  { %p206_p10 = pnand %p204_p9, %p201_p8 }
  0x19   :  { %209 = shalt.err (!%p206_p10)
}
  0x1a   :  { %s210_s8 = scalar_lea.vmem %s29_s27, 256  ;;  %p215_p12 = scmp.lt.s32.totalorder %s29_s27, %s29_s27 }
  0x1b   :  { %p211_p11 = scmp.ne.s32.totalorder %s29_s27, %s210_s8  ;;  %p216_p13 = scmp.lt.s32.totalorder %s210_s8, %s210_s8 }
  0x1d   :  { %p217_p0 = por %p216_p13, %p215_p12 }
  0x1f   :  { %p218_p1 = pnand %p217_p0, %p211_p11 }
  0x21   :  { %221 = shalt.err (!%p218_p1)
}
  0x22   :  { %34 = dma.hbm_to_vmem [thread:$0]  %s326_s1, 256, %s29_s27, [#allocation6], %s251_s22, %s251_s22, %s252_s23  }
  0x23   :  { %244 = dma.done.wait [#allocation3], 128  }
  0x24   :  { %245 = vsyncadd [#allocation3], 4294967168 }
  0x25   :  { %246 = dma.done.wait [#allocation6], 256  }
  0x26   :  { %247 = vsyncadd [#allocation6], 4294967040  ;;  %v254_v0 = vmov 0.0   ;;  %vm255_vm0 = vmmov 0   ;;  %v175_v1 = vld [vmem:[#allocation5] sm:$0xff]   ;;  %v176_v2 = vld [vmem:[#allocation5 + $0x8] sm:$0xff]  }
  0x27   :  { %160 = vmatprep.subr.bf16.mxu0 %v254_v0  ;;  %164 = vmatprep.mubr.msk.bf16.mxu0 %vm255_vm0, %v254_v0  ;;  %v177_v3 = vld [vmem:[#allocation2] sm:$0xff]   ;;  %vm74_vm1 = vcmask 261120   ;;  %vm127_vm2 = vcmask 781312   ;;  %s256_s1 = smov [#allocation7]  }
  0x28   :  { %161 = vmatpush3.bf16.msra.mxu0 %v175_v1  ;;  %v148_v4 = vld [vmem:[%s327_s2] ss:$0 sm:$0xff]  ;;  %s135_s12 = sshll.u32 %s256_s1, 4  ;;  %s136_s12 = int_to_ptr.vmem [resolvable:$true] %s135_s12 }
  0x29   :  { %162 = vmatprep.subr.bf16.mxu0 %v254_v0  ;;  %s222_s13 = scalar_lea.vmem %s136_s12, 128  ;;  %p227_p3 = scmp.lt.s32.totalorder %s136_s12, %s136_s12 }
  0x2a   :  { %p223_p2 = scmp.ne.s32.totalorder %s136_s12, %s222_s13  ;;  %p228_p4 = scmp.lt.s32.totalorder %s222_s13, %s222_s13 }
  0x2c   :  { %163 = vmatpush3.bf16.msra.mxu0 %v176_v2  ;;  %p229_p5 = por %p228_p4, %p227_p3 }
  0x2e   :  { %p230_p6 = pnand %p229_p5, %p223_p2 }
  0x2f   :  { %165 = vmatmul.mubr.msk.bf16.vlgmr.msra.gmra.mrb[0].mxu0 %vm74_vm1, %v177_v3 }
 0x102   :  { %v112_v5 = vpop.f32.mrb[0].mxu0 }
 0x103   :  { %v113_v6 = vadd.f32 %v148_v4, %v112_v5  ;;  %v166_v7 = vpop.f32.mrb[1].mxu0 }
 0x104   :  { %v115_v8 = vpop.f32.mrb[2].mxu0 }
 0x105   :  { %v155_v9 = vpack.c.bf16 %v113_v6, %v113_v6  ;;  %v116_v10 = vadd.f32 %v148_v4, %v115_v8  ;;  %v167_v11 = vpop.f32.mrb[3].mxu0 }
 0x107   :  { %v156_v12 = vpack.c.bf16 %v116_v10, %v116_v10  ;;  %128 = vst.msk [vmem:[#allocation7] sm:$0xf] %vm127_vm2, %v155_v9 }
 0x109   :  { %129 = vst.msk [vmem:[#allocation7 + $0x4] sm:$0xf] %vm127_vm2, %v156_v12 }
 0x10a   :  { %233 = shalt.err (!%p230_p6)
}
 0x10b   :  { %s234_s15 = scalar_lea.hbm %s328_s3, 128 }
 0x10c   :  { %p235_p7 = scmp.ne.s32.totalorder %s328_s3, %s234_s15  ;;  %p238_p8 = scmp.lt.u32.totalorder %s234_s15, %s328_s3 }
 0x10e   :  { %p240_p9 = pnand %p238_p8, %p235_p7 }
 0x110   :  { %243 = shalt.err (!%p240_p9)
}
 0x111   :  { %141 = dma.vmem_to_hbm [thread:$0]  %s136_s12, 128, %s328_s3, [#allocation4], %s251_s22, %s251_s22, %s252_s23  }
 0x112   :  { %248 = dma.done.wait [#allocation4], 128  }
 0x113   :  { %249 = vsyncadd [#allocation4], 4294967168 }
 0x114   :  { %145 = vsyncpa [#allocation3], 1 }
 0x115   :  { %146 = vsyncpa [#allocation6], 1 }
 0x116   :  { %147 = vsyncpa [#allocation4], 1 }

</bundles_post_ra>
